<compile_context>
chip_gen: v6e
topology: v6e:2x2x1
jax: 0.10.0
libtpu: 0.0.40
codegen_flags: <defaults>
</compile_context>

<pallas_src>
import math

import jax
import jax.numpy as jnp
from jax.experimental import pallas as pl
from jax.experimental.pallas import tpu as pltpu


_SUBLANE = 8


def _round_up(x, m):
    return ((x + m - 1) // m) * m


def _device_info():
    """Return (vmem_capacity_bytes, assumed TensorCores per chip)."""
    try:
        vmem = int(pltpu.get_tpu_info().vmem_capacity_bytes)
    except Exception:
        return 64 << 20, 1  # conservative fallback: v7x-sized VMEM, no split
    # v7x exposes 64 MiB VMEM per TensorCore and has 2 TCs/chip; v5e/v6e have
    # 128 MiB and a single TC.
    n_tc = 2 if vmem <= (64 << 20) else 1
    return vmem, n_tc


def _plan(N, Dx, Dy, d, in_item, mxu_item, tile_rows, num_splits):
    """Pick (num_splits, inner, tile_rows, padded_N, vmem_limit_bytes)."""
    vmem_cap, n_tc = _device_info()
    budget = int(vmem_cap * 0.80)   # ~100 MiB on v5e/v6e, ~51 MiB on v7x
    reserve = 8 << 20               # headroom for compiler-internal scratch

    if num_splits is None:
        num_splits = n_tc           # 1 on v5e/v6e (serial split is pure cost)
    num_splits = max(1, int(num_splits))
    if N < num_splits * _SUBLANE:
        num_splits = 1
    per_split = pl.cdiv(N, num_splits)

    # Bytes that do not scale with the sample-tile size.
    fixed = (2 * (Dx + Dy) * d * mxu_item   # gated weights (double-buffered)
             + 2 * 2 * d * 4                # biases (f32, double-buffered)
             + 2 * d * d * 4)               # resident cov block (+ writeback)

    # Bytes per sample row inside one grid step.
    per_row = (2 * (Dx + Dy) * in_item      # double-buffered X / Y tiles
               + 2 * d * 4                  # xh / yh f32 intermediates
               + max(Dx, Dy) * 4)           # slack: dot temporaries / row mask
    if mxu_item != in_item:
        per_row += (Dx + Dy) * mxu_item     # in-kernel cast copies

    if tile_rows is None:
        max_tile = max(_SUBLANE, (budget - reserve - fixed) // per_row)
        if max_tile >= 512:
            tile = (max_tile // 256) * 256  # MXU-shaped reduction dim
        elif max_tile >= 128:
            tile = (max_tile // 128) * 128
        else:
            tile = (max_tile // _SUBLANE) * _SUBLANE
        tile = min(tile, 1024)              # diminishing returns past ~1K rows
    else:
        tile = max(_SUBLANE, (int(tile_rows) // _SUBLANE) * _SUBLANE)
    tile = min(tile, _round_up(per_split, _SUBLANE))
    tile = max(tile, _SUBLANE)

    inner = pl.cdiv(per_split, tile)
    n_pad = num_splits * inner * tile
    est = fixed + tile * per_row
    vmem_limit = int(min(max(est + reserve, 32 << 20), budget))
    return num_splits, inner, tile, n_pad, vmem_limit


# --------------------------------------------------------------------------- #
# Kernel
# --------------------------------------------------------------------------- #
def _make_cov_kernel(n_valid, tile, inner, needs_mask, mxu_dtype):
    """Accumulate partial covariance X_hat.T @ Y_hat over sample tiles.

    Grid = (splits, n_tiles).  cov_ref is the resident (d, d) f32 output block
    for the current split; zeroed on the first inner step, accumulated after.
    """

    def kernel(x_ref, y_ref, wx_ref, bx_ref, wy_ref, by_ref, cov_ref):
        @pl.when(pl.program_id(1) == 0)
        def _init():
            cov_ref[...] = jnp.zeros_like(cov_ref)

        # In-kernel cast of the streamed tile to the MXU dtype: keeps HBM
        # traffic at the input dtype (no wrapper-side astype pass over the
        # full N x D arrays).  Dense layer: MXU matmul with f32 accumulation,
        # bias add + tanh (EUP) in f32.
        xh = jnp.tanh(
            jnp.dot(x_ref[...].astype(mxu_dtype), wx_ref[...],
                    preferred_element_type=jnp.float32) + bx_ref[...])
        yh = jnp.tanh(
            jnp.dot(y_ref[...].astype(mxu_dtype), wy_ref[...],
                    preferred_element_type=jnp.float32) + by_ref[...])

        if needs_mask:
            # Zero the zero-padded sample rows (tanh(bias) != 0) so they do
            # not contaminate the covariance.
            row0 = (pl.program_id(0) * inner + pl.program_id(1)) * tile
            rows = jax.lax.broadcasted_iota(jnp.int32, xh.shape, 0) + row0
            xh = jnp.where(rows < n_valid, xh, jnp.float32(0.0))

        # Covariance contribution X_hat^T @ Y_hat: contract the sample axis
        # (axis 0 of both operands) directly -- no (d, N) transpose in VMEM.
        # Operands stay f32 so the accumulated covariance has no bf16 error.
        cov_ref[...] += jax.lax.dot_general(
            xh, yh, dimension_numbers=(((0,), (0,)), ((), ())),
            preferred_element_type=jnp.float32)

    return kernel


# --------------------------------------------------------------------------- #
# Wrapper
# --------------------------------------------------------------------------- #
def sparse_deep_cca_loss(X, Y, gate_x, gate_y, Wx, bx, Wy, by, reg_total,
                         *, mxu_dtype=jnp.float32, tile_rows=None,
                         num_splits=None):
    """Pallas forward pass of SparseDeepCCA (first-call / eval-gate path)."""
    N, Dx = X.shape
    Ny, Dy = Y.shape
    assert N == Ny, "X and Y must have the same number of samples"
    d = Wx.shape[1]
    assert Wy.shape[1] == d, "x_net and y_net must share the output width d"

    in_item = max(jnp.dtype(X.dtype).itemsize, jnp.dtype(Y.dtype).itemsize)
    mxu_item = jnp.dtype(mxu_dtype).itemsize
    num_splits, inner, tile, n_pad, vmem_limit = _plan(
        N, Dx, Dy, d, in_item, mxu_item, tile_rows, num_splits)

    # Fold eval-mode stochastic gates into the weights:
    #   (X * g) @ W == X @ (g[:, None] * W)   -- O(D*d) instead of O(N*D).
    wx_eff = (jnp.reshape(gate_x, (Dx, 1)).astype(jnp.float32) * Wx).astype(mxu_dtype)
    wy_eff = (jnp.reshape(gate_y, (Dy, 1)).astype(jnp.float32) * Wy).astype(mxu_dtype)
    bx2 = jnp.reshape(bx, (1, d)).astype(jnp.float32)
    by2 = jnp.reshape(by, (1, d)).astype(jnp.float32)

    Xp, Yp = X, Y
    if n_pad != N:
        Xp = jnp.pad(X, ((0, n_pad - N), (0, 0)))
        Yp = jnp.pad(Y, ((0, n_pad - N), (0, 0)))

    kernel = _make_cov_kernel(N, tile, inner, n_pad != N, mxu_dtype)

    cov_partial = pl.pallas_call(
        kernel,
        out_shape=jax.ShapeDtypeStruct((num_splits, d, d), jnp.float32),
        grid=(num_splits, inner),
        in_specs=[
            pl.BlockSpec((tile, Dx), lambda s, j: (s * inner + j, 0)),  # X tile
            pl.BlockSpec((tile, Dy), lambda s, j: (s * inner + j, 0)),  # Y tile
            # Constant-index parameter blocks (resident; their double-buffering
            # is included in the VMEM budget above).
            pl.BlockSpec((Dx, d), lambda s, j: (0, 0)),                  # Wx (gated)
            pl.BlockSpec((1, d), lambda s, j: (0, 0)),                   # bx
            pl.BlockSpec((Dy, d), lambda s, j: (0, 0)),                  # Wy (gated)
            pl.BlockSpec((1, d), lambda s, j: (0, 0)),                   # by
        ],
        out_specs=pl.BlockSpec((None, d, d), lambda s, j: (s, 0, 0)),
        compiler_params=pltpu.CompilerParams(
            dimension_semantics=("parallel", "arbitrary"),
            vmem_limit_bytes=vmem_limit),
    )(Xp, Yp, wx_eff, bx2, wy_eff, by2)

    # Epilogue in plain JAX: combine split partials, apply 1/(N-1), subtract
    # the scalar regularizer, off-diagonal |.| sum.  forward() returns -get_sdl.
    cov = jnp.sum(cov_partial, axis=0) * jnp.float32(1.0 / (N - 1))
    c = cov - jnp.asarray(reg_total, jnp.float32)
    a = jnp.abs(c)
    return -(jnp.sum(a) - jnp.sum(jnp.diagonal(a)))


# --------------------------------------------------------------------------- #
# Pure-JAX reference (same forward pass) for the sanity check
# --------------------------------------------------------------------------- #
def _reference_loss(X, Y, gate_x, gate_y, Wx, bx, Wy, by, reg_total):
    xh = jnp.tanh((X * gate_x) @ Wx + bx)
    yh = jnp.tanh((Y * gate_y) @ Wy + by)
    cov = (yh.T @ xh).T / (X.shape[0] - 1)
    a = jnp.abs(cov - reg_total)
    return -(jnp.sum(a) - jnp.sum(jnp.diagonal(a)))


if __name__ == "__main__":
    # Small, tile-friendly sizes: N samples, Dx / Dy input features, d net width.
    N, Dx, Dy, d = 256, 128, 128, 128
    lamx, lamy = 0.01, 0.01
    sigmax, sigmay = 1.0, 1.0

    key = jax.random.PRNGKey(0)
    kx, ky, kwx, kwy, kbx, kby = jax.random.split(key, 6)

    X = jax.random.normal(kx, (N, Dx), jnp.float32)
    Y = jax.random.normal(ky, (N, Dy), jnp.float32)

    # x_net / y_net parameters (Linear + tanh), deterministic init.
    Wx = jax.random.normal(kwx, (Dx, d), jnp.float32) * (1.0 / math.sqrt(Dx))
    Wy = jax.random.normal(kwy, (Dy, d), jnp.float32) * (1.0 / math.sqrt(Dy))
    bx = jax.random.normal(kbx, (1, d), jnp.float32) * 0.01
    by = jax.random.normal(kby, (1, d), jnp.float32) * 0.01

    # StochasticGates parameters: mu initialized to 0.5 (standard STG init).
    mu_x = jnp.full((Dx,), 0.5, jnp.float32)
    mu_y = jnp.full((Dy,), 0.5, jnp.float32)
    gate_x = jnp.clip(mu_x, 0.0, 1.0)          # eval-mode gates, shape (Dx,)
    gate_y = jnp.clip(mu_y, 0.0, 1.0)

    # get_reg(): lam * sum(Phi(mu / sigma)), Phi = standard normal CDF.
    def stg_reg(mu, lam, sigma):
        return lam * jnp.sum(0.5 * (1.0 + jax.lax.erf(mu / (sigma * math.sqrt(2.0)))))

    reg_total = stg_reg(mu_x, lamx, sigmax) + stg_reg(mu_y, lamy, sigmay)
    ref = _reference_loss(X, Y, gate_x, gate_y, Wx, bx, Wy, by, reg_total)

    # 1) f32 path, forced 2-way split: exercises init / accumulate / split sum.
    loss = sparse_deep_cca_loss(X, Y, gate_x, gate_y, Wx, bx, Wy, by, reg_total,
                                mxu_dtype=jnp.float32, num_splits=2)
    loss = jax.block_until_ready(loss)
    assert jnp.allclose(loss, ref, rtol=1e-4, atol=1e-2), (loss, ref)

    # 2) bf16 MXU operands (allowed on every chip), auto tiling / splits;
    #    covariance accumulation and operands stay f32.
    loss_bf16 = sparse_deep_cca_loss(X, Y, gate_x, gate_y, Wx, bx, Wy, by,
                                     reg_total, mxu_dtype=jnp.bfloat16)
    loss_bf16 = jax.block_until_ready(loss_bf16)
    assert jnp.allclose(loss_bf16, ref, rtol=2e-2, atol=2.0), (loss_bf16, ref)

    # 3) Ragged sample count: exercises the zero-pad + in-kernel row-mask path.
    Nr = 250
    ref_r = _reference_loss(X[:Nr], Y[:Nr], gate_x, gate_y, Wx, bx, Wy, by,
                            reg_total)
    loss_r = sparse_deep_cca_loss(X[:Nr], Y[:Nr], gate_x, gate_y, Wx, bx, Wy,
                                  by, reg_total, mxu_dtype=jnp.float32)
    loss_r = jax.block_until_ready(loss_r)
    assert jnp.allclose(loss_r, ref_r, rtol=1e-4, atol=1e-2), (loss_r, ref_r)

    print("KERNEL_OK")
</pallas_src>

<mosaic_0001>
module attributes {stable_mosaic.version = 11 : i64} {
  func.func @kernel(%arg0: i32, %arg1: i32, %arg2: memref<128x128xf32, #tpu.memory_space<vmem>>, %arg3: memref<128x128xf32, #tpu.memory_space<vmem>>, %arg4: memref<128x128xf32, #tpu.memory_space<vmem>>, %arg5: memref<1x128xf32, #tpu.memory_space<vmem>>, %arg6: memref<128x128xf32, #tpu.memory_space<vmem>>, %arg7: memref<1x128xf32, #tpu.memory_space<vmem>>, %arg8: memref<1x128x128xf32, #tpu.memory_space<vmem>>) attributes {dimension_semantics = [#tpu.dimension_semantics<parallel>, #tpu.dimension_semantics<arbitrary>], iteration_bounds = array<i64: 2, 1>, scalar_prefetch = 0 : i64, scratch_operands = 0 : i64, tpu.core_type = #tpu.core_type<tc>, window_params = [{transform_indices = @transform_0, window_bounds = array<i64: 128, 128>}, {transform_indices = @transform_1, window_bounds = array<i64: 128, 128>}, {pipeline_mode = #tpu.pipeline_mode<synchronous>, transform_indices = @transform_2, window_bounds = array<i64: 128, 128>}, {pipeline_mode = #tpu.pipeline_mode<synchronous>, transform_indices = @transform_3, window_bounds = array<i64: 1, 128>}, {pipeline_mode = #tpu.pipeline_mode<synchronous>, transform_indices = @transform_4, window_bounds = array<i64: 128, 128>}, {pipeline_mode = #tpu.pipeline_mode<synchronous>, transform_indices = @transform_5, window_bounds = array<i64: 1, 128>}, {transform_indices = @transform_6, window_bounds = array<i64: 1, 128, 128>}]} {
    %c0_i32 = arith.constant 0 : i32
    %0 = arith.cmpi eq, %arg1, %c0_i32 : i32
    %1 = arith.extui %0 : i1 to i32
    %c0_i32_0 = arith.constant 0 : i32
    %2 = arith.cmpi ne, %1, %c0_i32_0 : i32
    scf.if %2 {
      %cst_20 = arith.constant 0.000000e+00 : f32
      %24 = vector.broadcast %cst_20 : f32 to vector<128x128xf32>
      %c0_21 = arith.constant 0 : index
      %c0_22 = arith.constant 0 : index
      %c0_23 = arith.constant 0 : index
      %25 = vector.load %arg8[%c0_21, %c0_22, %c0_23] : memref<1x128x128xf32, #tpu.memory_space<vmem>>, vector<1x128x128xf32>
      %26 = vector.shape_cast %25 : vector<1x128x128xf32> to vector<128x128xf32>
      %27 = vector.shape_cast %24 : vector<128x128xf32> to vector<1x128x128xf32>
      tpu.vector_store %arg8[%c0_21, %c0_22, %c0_23], %27 {strides = array<i32>} : memref<1x128x128xf32, #tpu.memory_space<vmem>>, vector<1x128x128xf32>,
    } else {
    }
    %c0 = arith.constant 0 : index
    %c0_1 = arith.constant 0 : index
    %3 = vector.load %arg2[%c0, %c0_1] : memref<128x128xf32, #tpu.memory_space<vmem>>, vector<128x128xf32>
    %c0_2 = arith.constant 0 : index
    %c0_3 = arith.constant 0 : index
    %4 = vector.load %arg4[%c0_2, %c0_3] : memref<128x128xf32, #tpu.memory_space<vmem>>, vector<128x128xf32>
    %cst = arith.constant dense<0.000000e+00> : vector<128x128xf32>
    %5 = tpu.matmul %3, %4, %cst {dimension_numbers = #tpu.dot_dimension_numbers<[1], [0], [0], [1], [0, 0, 1, 1], [], []>} : vector<128x128xf32>, vector<128x128xf32>, vector<128x128xf32> -> vector<128x128xf32>
    %c0_4 = arith.constant 0 : index
    %c0_5 = arith.constant 0 : index
    %6 = vector.load %arg5[%c0_4, %c0_5] : memref<1x128xf32, #tpu.memory_space<vmem>>, vector<1x128xf32>
    %7 = vector.broadcast %6 : vector<1x128xf32> to vector<128x128xf32>
    %8 = arith.addf %5, %7 : vector<128x128xf32>
    %9 = math.tanh %8 : vector<128x128xf32>
    %c0_6 = arith.constant 0 : index
    %c0_7 = arith.constant 0 : index
    %10 = vector.load %arg3[%c0_6, %c0_7] : memref<128x128xf32, #tpu.memory_space<vmem>>, vector<128x128xf32>
    %c0_8 = arith.constant 0 : index
    %c0_9 = arith.constant 0 : index
    %11 = vector.load %arg6[%c0_8, %c0_9] : memref<128x128xf32, #tpu.memory_space<vmem>>, vector<128x128xf32>
    %cst_10 = arith.constant dense<0.000000e+00> : vector<128x128xf32>
    %12 = tpu.matmul %10, %11, %cst_10 {dimension_numbers = #tpu.dot_dimension_numbers<[1], [0], [0], [1], [0, 0, 1, 1], [], []>} : vector<128x128xf32>, vector<128x128xf32>, vector<128x128xf32> -> vector<128x128xf32>
    %c0_11 = arith.constant 0 : index
    %c0_12 = arith.constant 0 : index
    %13 = vector.load %arg7[%c0_11, %c0_12] : memref<1x128xf32, #tpu.memory_space<vmem>>, vector<1x128xf32>
    %14 = vector.broadcast %13 : vector<1x128xf32> to vector<128x128xf32>
    %15 = arith.addf %12, %14 : vector<128x128xf32>
    %16 = math.tanh %15 : vector<128x128xf32>
    %c0_13 = arith.constant 0 : index
    %c0_14 = arith.constant 0 : index
    %c0_15 = arith.constant 0 : index
    %17 = vector.load %arg8[%c0_13, %c0_14, %c0_15] : memref<1x128x128xf32, #tpu.memory_space<vmem>>, vector<1x128x128xf32>
    %18 = vector.shape_cast %17 : vector<1x128x128xf32> to vector<128x128xf32>
    %cst_16 = arith.constant dense<0.000000e+00> : vector<128x128xf32>
    %19 = tpu.matmul %9, %16, %cst_16 {dimension_numbers = #tpu.dot_dimension_numbers<[0], [0], [1], [1], [0, 1, 1, 1], [], []>} : vector<128x128xf32>, vector<128x128xf32>, vector<128x128xf32> -> vector<128x128xf32>
    %20 = arith.addf %18, %19 : vector<128x128xf32>
    %c0_17 = arith.constant 0 : index
    %c0_18 = arith.constant 0 : index
    %c0_19 = arith.constant 0 : index
    %21 = vector.load %arg8[%c0_17, %c0_18, %c0_19] : memref<1x128x128xf32, #tpu.memory_space<vmem>>, vector<1x128x128xf32>
    %22 = vector.shape_cast %21 : vector<1x128x128xf32> to vector<128x128xf32>
    %23 = vector.shape_cast %20 : vector<128x128xf32> to vector<1x128x128xf32>
    tpu.vector_store %arg8[%c0_17, %c0_18, %c0_19], %23 {strides = array<i32>} : memref<1x128x128xf32, #tpu.memory_space<vmem>>, vector<1x128x128xf32>,
    return
  }
  func.func @transform_0(%arg0: i32, %arg1: i32) -> (i32, i32) {
    %c1_i32 = arith.constant 1 : i32
    %0 = arith.muli %arg0, %c1_i32 : i32
    %1 = arith.addi %0, %arg1 : i32
    %c0_i32 = arith.constant 0 : i32
    %c0_i32_0 = arith.constant 0 : i32
    return %1, %c0_i32 : i32, i32
  }
  func.func @transform_1(%arg0: i32, %arg1: i32) -> (i32, i32) {
    %c1_i32 = arith.constant 1 : i32
    %0 = arith.muli %arg0, %c1_i32 : i32
    %1 = arith.addi %0, %arg1 : i32
    %c0_i32 = arith.constant 0 : i32
    %c0_i32_0 = arith.constant 0 : i32
    return %1, %c0_i32 : i32, i32
  }
  func.func @transform_2(%arg0: i32, %arg1: i32) -> (i32, i32) {
    %c0_i32 = arith.constant 0 : i32
    %c0_i32_0 = arith.constant 0 : i32
    %c0_i32_1 = arith.constant 0 : i32
    return %c0_i32, %c0_i32_0 : i32, i32
  }
  func.func @transform_3(%arg0: i32, %arg1: i32) -> (i32, i32) {
    %c0_i32 = arith.constant 0 : i32
    %c0_i32_0 = arith.constant 0 : i32
    %c0_i32_1 = arith.constant 0 : i32
    return %c0_i32, %c0_i32_0 : i32, i32
  }
  func.func @transform_4(%arg0: i32, %arg1: i32) -> (i32, i32) {
    %c0_i32 = arith.constant 0 : i32
    %c0_i32_0 = arith.constant 0 : i32
    %c0_i32_1 = arith.constant 0 : i32
    return %c0_i32, %c0_i32_0 : i32, i32
  }
  func.func @transform_5(%arg0: i32, %arg1: i32) -> (i32, i32) {
    %c0_i32 = arith.constant 0 : i32
    %c0_i32_0 = arith.constant 0 : i32
    %c0_i32_1 = arith.constant 0 : i32
    return %c0_i32, %c0_i32_0 : i32, i32
  }
  func.func @transform_6(%arg0: i32, %arg1: i32) -> (i32, i32, i32) {
    %c0_i32 = arith.constant 0 : i32
    %c0_i32_0 = arith.constant 0 : i32
    %c0_i32_1 = arith.constant 0 : i32
    return %arg0, %c0_i32, %c0_i32_0 : i32, i32, i32
  }
}

</mosaic_0001>

<bundles_post_ra>
// kernel: tpu_custom_call.1
= control target key start
LH: loop header
LB: loop body
LE: loop exit
PB: predicated region body
PF: predicated region fallthrough
CT: control target
= control target key end

     0   :  { %s2222_s0 = inlined_call_operand.hbm [shape: f32[256,128], index: 0, kind: input, shape index: {}]   ;;  %s2223_s1 = inlined_call_operand.hbm [shape: f32[256,128], index: 1, kind: input, shape index: {}]   ;;  %s2224_s2 = inlined_call_operand.hbm [shape: f32[128,128], index: 2, kind: input, shape index: {}]   ;;  %s2225_s3 = inlined_call_operand.vmem [shape: f32[1,128], index: 3, kind: input, shape index: {}]   ;;  %s2226_s4 = inlined_call_operand.hbm [shape: f32[128,128], index: 4, kind: input, shape index: {}]   ;;  %s2227_s5 = inlined_call_operand.vmem [shape: f32[1,128], index: 5, kind: input, shape index: {}]   ;;  %s2228_s6 = inlined_call_operand.hbm [shape: f32[2,128,128], index: 6, kind: output, shape index: {}]  }
   0x1   :  { %2234 = sst [smem:[#allocation17_spill]] %s2222_s0 }
   0x2   :  { %2235 = sst [smem:[#allocation18_spill]] %s2223_s1 }
   0x3   :  { %2236 = sst [smem:[#allocation19_spill]] %s2224_s2 }
   0x4   :  { %2237 = sst [smem:[#allocation20_spill]] %s2226_s4 }
   0x5   :  { %11 = vsyncpa [#allocation3], 0 }
   0x6   :  { %13 = vsyncpa [#allocation3 + $0x1], 0 }
   0x7   :  { %14 = vsyncpa [#allocation6], 0 }
   0x8   :  { %16 = vsyncpa [#allocation6 + $0x1], 0 }
   0x9   :  { %17 = vsyncpa [#allocation9], 0 }
   0xa   :  { %18 = vsyncpa [#allocation4], 0 }
   0xb   :  { %20 = vsyncpa [#allocation4 + $0x1], 0  ;;  %s1872_s21 = smov 0   ;;  %s1874_s22 = smov 0  }
   0xc   :  { %s1876_s23 = smov 0   ;;  %s1878_s24 = smov 0  }
   0xd   :  { %s1880_s25 = smov 0   ;;  %s1882_s26 = smov 0  }
   0xe LB: > { %s1903_s27 = sadd.s32 4294967295, %s1826_s26   ;;  %s1146_s28 = sadd.s32 4294967294, %s1826_s26   ;;  %s1826_s26 = sphi %s1882_s26, %s26_s26   ;;  %s1822_s25 = sphi %s1880_s25, %s2257_s25   ;;  %s1818_s24 = sphi %s1878_s24, %s2256_s24   ;;  %s1814_s23 = sphi %s1876_s23, %s2255_s23   ;;  %s1810_s22 = sphi %s1874_s22, %s2254_s22   ;;  %s1806_s21 = sphi %s1872_s21, %s2253_s21  }
   0xf   : > { %p60_p0 = scmp.ne.s32.totalorder %s1810_s22, %s1806_s21  ;;  %p61_p1 = scmp.eq.s32.totalorder %s1903_s27, 0 }
  0x10   : > { %p196_p2 = scmp.eq.s32.totalorder %s1903_s27, 1  ;;  %p202_p3 = scmp.eq.s32.totalorder %s1146_s28, 1 }
  0x11   : > { %p1912_p4 = por %p61_p1, %p60_p0  ;;  %p1147_p5 = scmp.ge.s32.totalorder %s1826_s26, 1 }
  0x12   : > { %p1917_p6 = por %p202_p3, %p60_p0  ;;  %p209_p7 = scmp.lt.s32.totalorder %s1826_s26, 3 }
  0x13   : > { %s1828_s8 = smov [#allocation7]   ;;  %s1829_s11 = smov [#allocation8]  }
  0x14   : > { %p1922_p8 = pnand %p1147_p5, %p209_p7  ;;  %s221_s9 = sshll.u32 %s1828_s8, 4  ;;  %s222_s9 = int_to_ptr.vmem [resolvable:$true] %s221_s9 }
  0x15   : > { %s237_s12 = sshll.u32 %s1829_s11, 4  ;;  %s1637_s13 = scalar_lea.vmem %s222_s9, 2048  ;;  %s238_s12 = int_to_ptr.vmem [resolvable:$true] %s237_s12 }
  0x16   : > { %p1483_p9 = pneg %p1922_p8  ;;  %p1638_p13 = scmp.ne.s32.totalorder %s222_s9, %s1637_s13 }
  0x17   : > { %p1645_p5 = scmp.lt.s32.totalorder %s222_s9, %s222_s9  ;;  %p1646_p7 = scmp.lt.s32.totalorder %s1637_s13, %s1637_s13 }
  0x18   : > { %p1931_p11 = pnand %p1483_p9, %p61_p1 }
  0x19   : > { %p1647_p10 = por %p1646_p7, %p1645_p5 }
  0x1a   : > { %p1628_p12 = pneg %p1931_p11 }
  0x1c   : > { %p1640_p0 = pnand %p1638_p13, %p1628_p12 }
  0x1e   : > { %p1641_p3 = pneg %p1640_p0 }
  0x20   : > { %p1648_p9 = pnand %p1647_p10, %p1641_p3 }
  0x22   : > { %1651 = shalt.err (!%p1648_p9)
}
  0x23   : > { %s2229_s14 = smov 128   ;;  %s2231_s15 = smov 8  }
  0x24   : > { %s2242_s2 = sld [smem:[#allocation19_spill]]  ;;  %s1663_s18 = scalar_lea.vmem %s238_s12, 2048 }
  0x25   : > { %p1664_p13 = scmp.ne.s32.totalorder %s238_s12, %s1663_s18  ;;  %p1671_p10 = scmp.lt.s32.totalorder %s238_s12, %s238_s12 }
  0x26   : > { %p1672_p3 = scmp.lt.s32.totalorder %s1663_s18, %s1663_s18 }
  0x27   : > { %p1666_p0 = pnand %p1664_p13, %p1628_p12 }
  0x28   : > { %p1673_p7 = por %p1672_p3, %p1671_p10 }
  0x29   : > { %p1667_p5 = pneg %p1666_p0 }
  0x2a   : > { %1486 = dma.hbm_to_vmem [thread:$0]  (!%p1931_p11), %s2242_s2, 2048, %s222_s9, [#allocation6], %s2229_s14, %s2229_s14, %s2231_s15  }
  0x2b   : > { %p1674_p9 = pnand %p1673_p7, %p1667_p5 }
  0x2d   : > { %1677 = shalt.err (!%p1674_p9)
}
  0x2e   : > { %s2243_s4 = sld [smem:[#allocation20_spill]]  ;;  %s38_s28 = sadd.s32 1, %s1822_s25 }
  0x2f   : > { %s47_s8 = sadd.s32 1, %s1814_s23  ;;  %p40_p12 = scmp.ge.s32.totalorder %s38_s28, 2 }
  0x30   : > { %p54_p13 = scmp.ne.s32.totalorder %s1814_s23, %s1810_s22  ;;  %p55_p0 = scmp.eq.s32.totalorder %s1826_s26, 0 }
  0x31   : > { %p1503_p5 = scmp.lt.s32.totalorder %s1826_s26, 2  ;;  %s2259_s28 = smov (%p40_p12, %s38_s28), 0 }
  0x32   : > { %2244 = sst [smem:[#allocation16_spill]] %s2259_s28  ;;  %p56_p10 = por %p55_p0, %p54_p13 }
  0x33   : > { %p1969_p3 = por %p196_p2, %p54_p13  ;;  %s44_s10 = ssub.s32 %s1822_s25, %s2259_s28 }
  0x34   : > { %1489 = dma.hbm_to_vmem [thread:$0]  (!%p1931_p11), %s2243_s4, 2048, %s238_s12, [#allocation9], %s2229_s14, %s2229_s14, %s2231_s15  }
  0x35   : > { %s254_s11 = sand.u32 1, %s1814_s23   ;;  %p45_p7 = scmp.eq.s32.totalorder %s44_s10, 0 }
  0x36   : > { %s1976_s12 = sshll.u32 %s254_s11, 7  ;;  %s1170_s13 = sshll.u32 %s1822_s25, 11 }
  0x37   : > { %s1980_s16 = scalar_select %p45_p7, %s1814_s23, %s47_s8  }
  0x38   : > { %s2246_s0 = sld [smem:[#allocation17_spill]]  ;;  %s258_s20 = scalar_lea.vmem [#allocation2], %s1976_s12 }
  0x39   : > { %s266_s14 = sshll.u32 %s258_s20, 4  ;;  %p1988_p2 = pnand %p1503_p5, %p56_p10  ;;  %s267_s14 = int_to_ptr.vmem [resolvable:$true] %s266_s14 }
  0x3a   : > { %s2248_s1 = sld [smem:[#allocation18_spill]]  ;;  %s255_s8 = scalar_lea.sflag [#allocation3], %s254_s11 }
  0x3b   : > { %p1680_p11 = pneg %p1988_p2  ;;  %s1691_s17 = scalar_lea.vmem %s267_s14, 2048 }
  0x3c   : > { %p1692_p9 = scmp.ne.s32.totalorder %s267_s14, %s1691_s17  ;;  %s1832_s18 = smov [#allocation2]  }
  0x3d   : > { %s1696_s20 = sshll.u32 %s1832_s18, 4  ;;  %s1697_s20 = int_to_ptr.vmem [resolvable:$false] %s1696_s20 }
  0x3e   : > { %s265_s19 = scalar_lea.hbm %s2246_s0, %s1170_s13  ;;  %p1694_p12 = pnand %p1692_p9, %p1680_p11 }
  0x3f   : > { %s1698_s0 = scalar_lea.vmem %s1697_s20, 4096  ;;  %p1699_p0 = scmp.lt.s32.totalorder %s267_s14, %s1697_s20 }
  0x40   : > { %s1995_s4 = scalar_lea.hbm %s2248_s1, %s1170_s13  ;;  %p1695_p13 = pneg %p1694_p12 }
  0x41   : > { %p1700_p5 = scmp.lt.s32.totalorder %s1698_s0, %s1691_s17 }
  0x43   : > { %p1701_p10 = por %p1700_p5, %p1699_p0 }
  0x45   : > { %p1702_p7 = pnand %p1701_p10, %p1695_p13 }
  0x47   : > { %1705 = shalt.err (!%p1702_p7)
}
  0x48   : > { %s2249_s2 = smov 8   ;;  %s2250_s11 = smov 128  }
  0x49   : > { %1493 = dma.hbm_to_vmem [thread:$0]  (!%p1988_p2), %s265_s19, 2048, %s267_s14, %s255_s8, %s2250_s11, %s2250_s11, %s2249_s2  }
  0x4a   : > { %s280_s13 = scalar_lea.vmem [#allocation5], %s1976_s12  ;;  %s276_s1 = sand.u32 1, %s1826_s26  }
  0x4b   : > { %s288_s10 = sshll.u32 %s280_s13, 4  ;;  %s277_s18 = scalar_lea.sflag [#allocation6], %s276_s1  ;;  %s289_s10 = int_to_ptr.vmem [resolvable:$true] %s288_s10 }
  0x4c   : > { %s1719_s28 = scalar_lea.vmem %s289_s10, 2048  ;;  %s1833_s0 = smov [#allocation5]  }
  0x4d   : > { %p1720_p9 = scmp.ne.s32.totalorder %s289_s10, %s1719_s28  ;;  %s1724_s17 = sshll.u32 %s1833_s0, 4  ;;  %s1725_s17 = int_to_ptr.vmem [resolvable:$false] %s1724_s17 }
  0x4e   : > { %s1726_s20 = scalar_lea.vmem %s1725_s17, 4096  ;;  %p1727_p0 = scmp.lt.s32.totalorder %s289_s10, %s1725_s17 }
  0x4f   : > { %p1722_p12 = pnand %p1720_p9, %p1680_p11  ;;  %p1728_p5 = scmp.lt.s32.totalorder %s1726_s20, %s1719_s28 }
  0x51   : > { %p1723_p13 = pneg %p1722_p12  ;;  %p1729_p10 = por %p1728_p5, %p1727_p0 }
  0x53   : > { %p1730_p7 = pnand %p1729_p10, %p1723_p13 }
  0x55   : > { %1733 = shalt.err (!%p1730_p7)
}
  0x56   : > { %1496 = dma.hbm_to_vmem [thread:$0]  (!%p1988_p2), %s1995_s4, 2048, %s289_s10, %s277_s18, %s2250_s11, %s2250_s11, %s2249_s2  }
  0x57   : > { %300 = sbr.rel (%p1922_p8) target bundleno = 738 (0x2e2), region = 44  ;;  %s2021_s1 = sand.u32 (!%p1922_p8), 1, %s1810_s22  }
  0x58   : > { %s2024_s14 = sshll.u32 (!%p1922_p8), %s2021_s1, 7  ;;  %s303_s28 = scalar_lea.sflag (!%p1922_p8), [#allocation3], %s2021_s1 }
  0x59   : > { %s2028_s12 = scalar_lea.vmem (!%p1922_p8), [#allocation2], %s2024_s14 }
  0x5c   : > { %1785 = dma.done.wait (%p1912_p4), %s303_s28, 2048  }
  0x5d   : > { %1787 = vsyncadd (%p1912_p4), %s303_s28, 4294965248  ;;  %s311_s4 = sand.u32 1, %s1903_s27   ;;  %s2036_s15 = scalar_lea.vmem [#allocation5], %s2024_s14 }
  0x5e   : > { %s312_s7 = scalar_lea.sflag [#allocation6], %s311_s4 }
  0x5f   : > { %1789 = dma.done.wait (%p1912_p4), %s312_s7, 2048  }
  0x60   : > { %1791 = vsyncadd (%p1912_p4), %s312_s7, 4294965248 }
  0x61   : > { %1793 = dma.done.wait (%p61_p1), [#allocation6], 2048  }
  0x62   : > { %1795 = vsyncadd (%p61_p1), [#allocation6], 4294965248 }
  0x63   : > { %1797 = dma.done.wait (%p61_p1), [#allocation9], 2048  }
  0x64   : > { %1799 = vsyncadd (%p61_p1), [#allocation9], 4294965248  ;;  %v412_v0 = vld [vmem:[#allocation7 + $0x78] sm:$0xff]  ;;  %v411_v1 = vld [vmem:[#allocation7 + $0x70] sm:$0xff]  ;;  %s2149_s2 = scalar_lea.vmem [#allocation10], %s2024_s14  ;;  %s1172_s11 = sshll.u32 %s1818_s24, 11 }
  0x65   : > { %1269 = vmatprep.subr.mxu0 %v412_v0  ;;  %v410_v2 = vld [vmem:[#allocation7 + $0x68] sm:$0xff]  ;;  %v409_v3 = vld [vmem:[#allocation7 + $0x60] sm:$0xff]  ;;  %v408_v5 = vld [vmem:[#allocation7 + $0x58] sm:$0xff]  ;;  %s1020_s13 = sshll.u32 %s2149_s2, 4  ;;  %s2170_s0 = scalar_lea.hbm %s2228_s6, %s1172_s11  ;;  %s2172_s13 = int_to_ptr.vmem [resolvable:$true] %s1020_s13 }
  0x66   : > { %1270 = vmatpush3.msra.mxu0 %v412_v0  ;;  %v381_v4 = vld [vmem:[%s2028_s12] sm:$0xff]  ;;  %v407_v6 = vld [vmem:[#allocation7 + $0x50] sm:$0xff]  ;;  %v612_v7 = vld [vmem:[#allocation8 + $0x78] sm:$0xff]  ;;  %s1007_s17 = scalar_lea.sflag [#allocation4], %s2021_s1  ;;  %s1734_s20 = scalar_lea.vmem %s2172_s13, 2048 }
  0x67   : > { %1271 = vmatprep.subr.mxu0 %v411_v1  ;;  %1301 = vmatprep.mubr.f32.mxu0 %v381_v4  ;;  %v611_v8 = vld [vmem:[#allocation8 + $0x70] sm:$0xff]  ;;  %v406_v9 = vld [vmem:[#allocation7 + $0x48] sm:$0xff]  ;;  %v405_v11 = vld [vmem:[#allocation7 + $0x40] sm:$0xff]  ;;  %p1735_p1 = scmp.ne.s32.totalorder %s2172_s13, %s1734_s20  ;;  %s1834_s24 = smov [#allocation10]  }
  0x68   : > { %1272 = vmatpush3.msra.mxu0 %v411_v1  ;;  %1325 = vmatprep.subr.mxu1 %v612_v7  ;;  %v610_v10 = vld [vmem:[#allocation8 + $0x68] sm:$0xff]  ;;  %v609_v12 = vld [vmem:[#allocation8 + $0x60] sm:$0xff]  ;;  %v404_v13 = vld [vmem:[#allocation7 + $0x38] sm:$0xff]  ;;  %s1738_s14 = sshll.u32 %s1834_s24, 4  ;;  %s1739_s14 = int_to_ptr.vmem [resolvable:$false] %s1738_s14 }
  0x69   : > { %1273 = vmatprep.subr.mxu0 %v410_v2  ;;  %1326 = vmatpush3.msra.mxu1 %v612_v7  ;;  %v608_v14 = vld [vmem:[#allocation8 + $0x58] sm:$0xff]  ;;  %v403_v15 = vld [vmem:[#allocation7 + $0x30] sm:$0xff]  ;;  %v402_v17 = vld [vmem:[#allocation7 + $0x28] sm:$0xff]  ;;  %p1736_p4 = pnand %p1735_p1, %p1969_p3  ;;  %s1740_s28 = scalar_lea.vmem %s1739_s14, 4096 }
  0x6a   : > { %1274 = vmatpush3.msra.mxu0 %v410_v2  ;;  %1327 = vmatprep.subr.mxu1 %v611_v8  ;;  %v607_v16 = vld [vmem:[#allocation8 + $0x50] sm:$0xff]  ;;  %v606_v18 = vld [vmem:[#allocation8 + $0x48] sm:$0xff]  ;;  %v401_v19 = vld [vmem:[#allocation7 + $0x20] sm:$0xff]  ;;  %p1741_p2 = scmp.lt.s32.totalorder %s2172_s13, %s1739_s14  ;;  %p1742_p11 = scmp.lt.s32.totalorder %s1740_s28, %s1734_s20 }
  0x6b   : > { %1275 = vmatprep.subr.mxu0 %v409_v3  ;;  %1328 = vmatpush3.msra.mxu1 %v611_v8  ;;  %v605_v20 = vld [vmem:[#allocation8 + $0x40] sm:$0xff]  ;;  %v400_v21 = vld [vmem:[#allocation7 + $0x18] sm:$0xff]  ;;  %v399_v23 = vld [vmem:[#allocation7 + $0x10] sm:$0xff]  ;;  %p1737_p8 = pneg %p1736_p4 }
  0x6c   : > { %1276 = vmatpush3.msra.mxu0 %v409_v3  ;;  %1329 = vmatprep.subr.mxu1 %v610_v10  ;;  %v604_v22 = vld [vmem:[#allocation8 + $0x38] sm:$0xff]  ;;  %v603_v24 = vld [vmem:[#allocation8 + $0x30] sm:$0xff]  ;;  %v398_v25 = vld [vmem:[#allocation7 + $0x8] sm:$0xff]  ;;  %p1743_p9 = por %p1742_p11, %p1741_p2 }
  0x6d   : > { %1277 = vmatprep.subr.mxu0 %v408_v5  ;;  %1330 = vmatpush3.msra.mxu1 %v610_v10  ;;  %v602_v26 = vld [vmem:[#allocation8 + $0x28] sm:$0xff]  ;;  %v397_v27 = vld [vmem:[#allocation7] sm:$0xff]  ;;  %v600_v30 = vld [vmem:[#allocation8 + $0x18] sm:$0xff] }
  0x6e   : > { %1278 = vmatpush3.msra.mxu0 %v408_v5  ;;  %1331 = vmatprep.subr.mxu1 %v609_v12  ;;  %v601_v28 = vld [vmem:[#allocation8 + $0x20] sm:$0xff]  ;;  %v382_v29 = vld [vmem:[%s2028_s12 + $0x8] sm:$0xff]  ;;  %v383_v31 = vld [vmem:[%s2028_s12 + $0x10] sm:$0xff]  ;;  %p1744_p12 = pnand %p1743_p9, %p1737_p8 }
  0x6f   : > { %1279 = vmatprep.subr.mxu0 %v407_v6  ;;  %1332 = vmatpush3.msra.mxu1 %v609_v12  ;;  %v599_v32 = vld [vmem:[#allocation8 + $0x10] sm:$0xff]  ;;  %v581_v33 = vld [vmem:[%s2036_s15] sm:$0xff]  ;;  %v384_v34 = vld [vmem:[%s2028_s12 + $0x18] sm:$0xff] }
  0x70   : > { %1280 = vmatpush3.msra.mxu0 %v407_v6  ;;  %1333 = vmatprep.subr.mxu1 %v608_v14  ;;  %v598_v35 = vld [vmem:[#allocation8 + $0x8] sm:$0xff]  ;;  %v385_v36 = vld [vmem:[%s2028_s12 + $0x20] sm:$0xff]  ;;  %v387_v40 = vld [vmem:[%s2028_s12 + $0x30] sm:$0xff] }
  0x71   : > { %1281 = vmatprep.subr.mxu0 %v406_v9  ;;  %1334 = vmatpush3.msra.mxu1 %v608_v14  ;;  %v597_v37 = vld [vmem:[#allocation8] sm:$0xff]  ;;  %v386_v38 = vld [vmem:[%s2028_s12 + $0x28] sm:$0xff]  ;;  %v583_v41 = vld [vmem:[%s2036_s15 + $0x10] sm:$0xff] }
  0x72   : > { %1282 = vmatpush3.msra.mxu0 %v406_v9  ;;  %1335 = vmatprep.subr.mxu1 %v607_v16  ;;  %v582_v39 = vld [vmem:[%s2036_s15 + $0x8] sm:$0xff]  ;;  %v388_v42 = vld [vmem:[%s2028_s12 + $0x38] sm:$0xff]  ;;  %v389_v44 = vld [vmem:[%s2028_s12 + $0x40] sm:$0xff] }
  0x73   : > { %1283 = vmatprep.subr.mxu0 %v405_v11  ;;  %1336 = vmatpush3.msra.mxu1 %v607_v16  ;;  %v584_v43 = vld [vmem:[%s2036_s15 + $0x18] sm:$0xff]  ;;  %v585_v45 = vld [vmem:[%s2036_s15 + $0x20] sm:$0xff]  ;;  %v390_v46 = vld [vmem:[%s2028_s12 + $0x48] sm:$0xff] }
  0x74   : > { %1284 = vmatpush3.msra.mxu0 %v405_v11  ;;  %1337 = vmatprep.subr.mxu1 %v606_v18  ;;  %v586_v47 = vld [vmem:[%s2036_s15 + $0x28] sm:$0xff]  ;;  %v391_v48 = vld [vmem:[%s2028_s12 + $0x50] sm:$0xff]  ;;  %v392_v50 = vld [vmem:[%s2028_s12 + $0x58] sm:$0xff] }
  0x75   : > { %1285 = vmatprep.subr.mxu0 %v404_v13  ;;  %1338 = vmatpush3.msra.mxu1 %v606_v18  ;;  %v587_v49 = vld [vmem:[%s2036_s15 + $0x30] sm:$0xff]  ;;  %v588_v51 = vld [vmem:[%s2036_s15 + $0x38] sm:$0xff]  ;;  %v393_v52 = vld [vmem:[%s2028_s12 + $0x60] sm:$0xff] }
  0x76   : > { %1286 = vmatpush3.msra.mxu0 %v404_v13  ;;  %1339 = vmatprep.subr.mxu1 %v605_v20  ;;  %v589_v53 = vld [vmem:[%s2036_s15 + $0x40] sm:$0xff]  ;;  %v394_v54 = vld [vmem:[%s2028_s12 + $0x68] sm:$0xff]  ;;  %v395_v56 = vld [vmem:[%s2028_s12 + $0x70] sm:$0xff] }
  0x77   : > { %1287 = vmatprep.subr.mxu0 %v403_v15  ;;  %1340 = vmatpush3.msra.mxu1 %v605_v20  ;;  %v590_v55 = vld [vmem:[%s2036_s15 + $0x48] sm:$0xff]  ;;  %v591_v57 = vld [vmem:[%s2036_s15 + $0x50] sm:$0xff]  ;;  %v396_v58 = vld [vmem:[%s2028_s12 + $0x78] sm:$0xff] }
  0x78   : > { %1288 = vmatpush3.msra.mxu0 %v403_v15  ;;  %1341 = vmatprep.subr.mxu1 %v604_v22  ;;  %v592_v59 = vld [vmem:[%s2036_s15 + $0x58] sm:$0xff]  ;;  %v593_v60 = vld [vmem:[%s2036_s15 + $0x60] sm:$0xff]  ;;  %v594_v61 = vld [vmem:[%s2036_s15 + $0x68] sm:$0xff] }
  0x79   : > { %1289 = vmatprep.subr.mxu0 %v402_v17  ;;  %1342 = vmatpush3.msra.mxu1 %v604_v22  ;;  %v595_v62 = vld [vmem:[%s2036_s15 + $0x70] sm:$0xff]  ;;  %v596_v63 = vld [vmem:[%s2036_s15 + $0x78] sm:$0xff]  ;;  %v2085_v1 = vld [vmem:[%s2225_s3] ss:$0 sm:$0xff] }
  0x7a   : > { %1290 = vmatpush3.msra.mxu0 %v402_v17  ;;  %1343 = vmatprep.subr.mxu1 %v603_v24 }
  0x7b   : > { %1291 = vmatprep.subr.mxu0 %v401_v19  ;;  %1344 = vmatpush3.msra.mxu1 %v603_v24 }
  0x7c   : > { %1292 = vmatpush3.msra.mxu0 %v401_v19  ;;  %1345 = vmatprep.subr.mxu1 %v602_v26 }
  0x7d   : > { %1293 = vmatprep.subr.mxu0 %v400_v21  ;;  %1346 = vmatpush3.msra.mxu1 %v602_v26 }
  0x7e   : > { %1294 = vmatpush3.msra.mxu0 %v400_v21  ;;  %1347 = vmatprep.subr.mxu1 %v601_v28 }
  0x7f   : > { %1295 = vmatprep.subr.mxu0 %v399_v23  ;;  %1348 = vmatpush3.msra.mxu1 %v601_v28 }
  0x80   : > { %1296 = vmatpush3.msra.mxu0 %v399_v23  ;;  %1349 = vmatprep.subr.mxu1 %v600_v30 }
  0x81   : > { %1297 = vmatprep.subr.mxu0 %v398_v25  ;;  %1350 = vmatpush3.msra.mxu1 %v600_v30 }
  0x82   : > { %1298 = vmatpush3.msra.mxu0 %v398_v25  ;;  %1351 = vmatprep.subr.mxu1 %v599_v32 }
  0x83   : > { %1299 = vmatprep.subr.mxu0 %v397_v27  ;;  %1357 = vmatprep.mubr.f32.mxu1 %v581_v33 }
  0x84   : > { %1300 = vmatpush3.msra.mxu0 %v397_v27  ;;  %1352 = vmatpush3.msra.mxu1 %v599_v32 }
  0x85   : > { %1302 = vmatmul.mubr.f32.vlgmr.msra.gmra.mxu0 %v382_v29  ;;  %1353 = vmatprep.subr.mxu1 %v598_v35 }
  0x86   : > { %1304 = vmatprep.mubr.f32.mxu0 %v383_v31  ;;  %1354 = vmatpush3.msra.mxu1 %v598_v35 }
  0x87   : > { %1355 = vmatprep.subr.mxu1 %v597_v37 }
  0x88   : > { %1356 = vmatpush3.msra.mxu1 %v597_v37 }
  0x89   : > { %1305 = vmatmul.mubr.f32.gmra.mxu0 %v384_v34  ;;  %1358 = vmatmul.mubr.f32.vlgmr.msra.gmra.mxu1 %v582_v39 }
  0x8a   : > { %1307 = vmatprep.mubr.f32.mxu0 %v385_v36  ;;  %1360 = vmatprep.mubr.f32.mxu1 %v583_v41 }
  0x8d   : > { %1308 = vmatmul.mubr.f32.gmra.mxu0 %v386_v38  ;;  %1361 = vmatmul.mubr.f32.gmra.mxu1 %v584_v43 }
  0x8e   : > { %1310 = vmatprep.mubr.f32.mxu0 %v387_v40  ;;  %1363 = vmatprep.mubr.f32.mxu1 %v585_v45  ;;  %v2116_v40 = vld [vmem:[%s2227_s5] ss:$0 sm:$0xff] }
  0x91   : > { %1311 = vmatmul.mubr.f32.gmra.mxu0 %v388_v42  ;;  %1364 = vmatmul.mubr.f32.gmra.mxu1 %v586_v47 }
  0x92   : > { %1313 = vmatprep.mubr.f32.mxu0 %v389_v44  ;;  %1366 = vmatprep.mubr.f32.mxu1 %v587_v49 }
  0x95   : > { %1314 = vmatmul.mubr.f32.gmra.mxu0 %v390_v46  ;;  %1367 = vmatmul.mubr.f32.gmra.mxu1 %v588_v51 }
  0x96   : > { %1316 = vmatprep.mubr.f32.mxu0 %v391_v48  ;;  %1369 = vmatprep.mubr.f32.mxu1 %v589_v53 }
  0x99   : > { %1317 = vmatmul.mubr.f32.gmra.mxu0 %v392_v50  ;;  %1370 = vmatmul.mubr.f32.gmra.mxu1 %v590_v55 }
  0x9a   : > { %1319 = vmatprep.mubr.f32.mxu0 %v393_v52  ;;  %1372 = vmatprep.mubr.f32.mxu1 %v591_v57 }
  0x9d   : > { %1320 = vmatmul.mubr.f32.gmra.mxu0 %v394_v54  ;;  %1373 = vmatmul.mubr.f32.gmra.mxu1 %v592_v59 }
  0x9e   : > { %1322 = vmatprep.mubr.f32.mxu0 %v395_v56  ;;  %1375 = vmatprep.mubr.f32.mxu1 %v593_v60 }
  0xa1   : > { %1323 = vmatmul.mubr.f32.gmra.mxu0 %v396_v58  ;;  %1376 = vmatmul.mubr.f32.gmra.mxu1 %v594_v61 }
  0xa2   : > { %1378 = vmatprep.mubr.f32.mxu1 %v595_v62 }
  0xa5   : > { %1379 = vmatmul.mubr.f32.gmra.mxu1 %v596_v63 }
 0x145   : > { %v1303_v0 = vpop.f32.mrf.mxu0 }
 0x146   : > { %v492_v5 = vadd.f32 %v1303_v0, %v2085_v1 }
 0x147   : > { %v486_v2 = vpop.f32.mrf.mxu0 }
 0x148   : > { %v487_v3 = vadd.f32 %v2085_v1, %v486_v2 }
 0x149   : > { %v1306_v4 = vpop.f32.mrf.mxu0  ;;  %v2089_v7 = vpop.f32.mrf.mxu1 }
 0x14a   : > { %1562 = vtanh.f32 %v487_v3  ;;  %v502_v12 = vadd.f32 %v1306_v4, %v2085_v1 }
 0x14b   : > { %v496_v6 = vpop.f32.mrf.mxu0  ;;  %1564 = vtanh.f32 %v492_v5  ;;  %v2092_v10 = vpop.f32.mrf.mxu1 }
 0x14c   : > { %v497_v8 = vadd.f32 %v2085_v1, %v496_v6 }
 0x14d   : > { %v1309_v9 = vpop.f32.mrf.mxu0  ;;  %v2094_v11 = vpop.f32.mrf.mxu1 }
 0x14e   : > { %1566 = vtanh.f32 %v497_v8  ;;  %v512_v21 = vadd.f32 %v1309_v9, %v2085_v1 }
 0x14f   : > { %v506_v13 = vpop.f32.mrf.mxu0  ;;  %v2097_v14 = vpop.f32.mrf.mxu1  ;;  %1568 = vtanh.f32 %v502_v12 }
 0x150   : > { %v507_v16 = vadd.f32 %v2085_v1, %v506_v13 }
 0x151   : > { %v2099_v15 = vpop.f32.mrf.mxu1  ;;  %v1312_v18 = vpop.f32.mrf.mxu0 }
 0x152   : > { %1570 = vtanh.f32 %v507_v16  ;;  %v522_v31 = vadd.f32 %v1312_v18, %v2085_v1  ;;  %v712_v9 = vadd.f32 %v2099_v15, %v2116_v40  ;;  %v702_v15 = vadd.f32 %v2094_v11, %v2116_v40 }
 0x153   : > { %v2102_v19 = vpop.f32.mrf.mxu1  ;;  %v516_v23 = vpop.f32.mrf.mxu0  ;;  %1572 = vtanh.f32 %v512_v21  ;;  %v692_v11 = vadd.f32 %v2089_v7, %v2116_v40 }
 0x154   : > { %v517_v26 = vadd.f32 %v2085_v1, %v516_v23 }
 0x155   : > { %v2104_v20 = vpop.f32.mrf.mxu1  ;;  %v1315_v28 = vpop.f32.mrf.mxu0 }
 0x156   : > { %1574 = vtanh.f32 %v517_v26  ;;  %v532_v38 = vadd.f32 %v1315_v28, %v2085_v1  ;;  %v722_v0 = vadd.f32 %v2104_v20, %v2116_v40 }
 0x157   : > { %v1563_v17 = vpop.eup %1562  ;;  %v2107_v24 = vpop.f32.mrf.mxu1  ;;  %1576 = vtanh.f32 %v522_v31 }
 0x158   : > { %797 = vxpose.xlu0.b32.start [1/16] %v1563_v17, 128  ;;  %v1565_v22 = vpop.eup %1564  ;;  %v526_v33 = vpop.f32.mrf.mxu0  ;;  %v717_v3 = vadd.f32 %v2116_v40, %v2107_v24  ;;  %v707_v17 = vadd.f32 %v2116_v40, %v2102_v19  ;;  %v697_v19 = vadd.f32 %v2116_v40, %v2097_v14  ;;  %v687_v14 = vadd.f32 %v2116_v40, %v2092_v10 }
 0x159   : > { %v1371_v25 = vpop.f32.mrf.mxu1  ;;  %v527_v36 = vadd.f32 %v2085_v1, %v526_v33 }
 0x15a   : > { %v1318_v39 = vpop.f32.mrf.mxu0  ;;  %v732_v58 = vadd.f32 %v1371_v25, %v2116_v40 }
 0x15b   : > { %v1567_v27 = vpop.eup %1566  ;;  %v726_v29 = vpop.f32.mrf.mxu1  ;;  %1578 = vtanh.f32 %v527_v36  ;;  %v542_v55 = vadd.f32 %v1318_v39, %v2085_v1 }
 0x15c   : > { %798 = vxpose.xlu0.b32.cont [2/16] %v1565_v22, 128  ;;  %v1569_v32 = vpop.eup %1568  ;;  %1580 = vtanh.f32 %v532_v38  ;;  %v536_v46 = vpop.f32.mrf.mxu0  ;;  %v727_v60 = vadd.f32 %v2116_v40, %v726_v29 }
 0x15d   : > { %v1374_v30 = vpop.f32.mrf.mxu1  ;;  %v537_v50 = vadd.f32 %v2085_v1, %v536_v46 }
 0x15e   : > { %v1321_v51 = vpop.f32.mrf.mxu0  ;;  %v742_v53 = vadd.f32 %v1374_v30, %v2116_v40 }
 0x15f   : > { %v736_v34 = vpop.f32.mrf.mxu1  ;;  %v1571_v37 = vpop.eup %1570  ;;  %v552_v5 = vadd.f32 %v1321_v51, %v2085_v1 }
 0x160   : > { %799 = vxpose.xlu0.b32.cont [3/16] %v1567_v27, 128  ;;  %v1573_v45 = vpop.eup %1572  ;;  %v737_v54 = vadd.f32 %v2116_v40, %v736_v34  ;;  %v546_v56 = vpop.f32.mrf.mxu0 }
 0x161   : > { %v1377_v35 = vpop.f32.mrf.mxu1  ;;  %v547_v59 = vadd.f32 %v2085_v1, %v546_v56 }
 0x162   : > { %v752_v42 = vadd.f32 %v1377_v35, %v2116_v40  ;;  %v1324_v62 = vpop.f32.mrf.mxu0 }
 0x163   : > { %v746_v41 = vpop.f32.mrf.mxu1  ;;  %v1575_v52 = vpop.eup %1574  ;;  %v562_v21 = vadd.f32 %v1324_v62, %v2085_v1 }
 0x164   : > { %800 = vxpose.xlu0.b32.cont [4/16] %v1569_v32, 128  ;;  %v747_v49 = vadd.f32 %v2116_v40, %v746_v41  ;;  %v1577_v57 = vpop.eup %1576  ;;  %v556_v8 = vpop.f32.mrf.mxu0 }
 0x165   : > { %v1380_v43 = vpop.f32.mrf.mxu1  ;;  %v557_v13 = vadd.f32 %v2085_v1, %v556_v8 }
 0x166   : > { %v762_v44 = vadd.f32 %v1380_v43, %v2116_v40 }
 0x167   : > { %v756_v47 = vpop.f32.mrf.mxu1 }
 0x168   : > { %801 = vxpose.xlu0.b32.cont [5/16] %v1571_v37, 128  ;;  %1582 = vtanh.f32 %v762_v44  ;;  %v757_v48 = vadd.f32 %v2116_v40, %v756_v47  ;;  %v1579_v61 = vpop.eup %1578 }
 0x169   : > { %1584 = vtanh.f32 %v752_v42  ;;  %v1581_v63 = vpop.eup %1580 }
 0x16a   : > { %1586 = vtanh.f32 %v757_v48 }
 0x16b   : > { %1588 = vtanh.f32 %v747_v49 }
 0x16c   : > { %802 = vxpose.xlu0.b32.cont [6/16] %v1573_v45, 128  ;;  %1590 = vtanh.f32 %v537_v50 }
 0x16d   : > { %1592 = vtanh.f32 %v742_v53 }
 0x16e   : > { %1594 = vtanh.f32 %v737_v54 }
 0x16f   : > { %1596 = vtanh.f32 %v542_v55 }
 0x170   : > { %803 = vxpose.xlu0.b32.cont [7/16] %v1575_v52, 128  ;;  %1598 = vtanh.f32 %v732_v58 }
 0x171   : > { %1600 = vtanh.f32 %v547_v59 }
 0x172   : > { %1602 = vtanh.f32 %v727_v60 }
 0x173   : > { %1604 = vtanh.f32 %v722_v0 }
 0x174   : > { %804 = vxpose.xlu0.b32.cont [8/16] %v1577_v57, 128  ;;  %1606 = vtanh.f32 %v717_v3 }
 0x175   : > { %v1583_v2 = vpop.eup %1582  ;;  %1608 = vtanh.f32 %v552_v5 }
 0x176   : > { %v1585_v4 = vpop.eup %1584  ;;  %1381 = vmatprep.subr.mxu0 %v1583_v2  ;;  %1437 = vmatprep.subr.mxu1 %v1583_v2  ;;  %1610 = vtanh.f32 %v712_v9 }
 0x177   : > { %v1587_v6 = vpop.eup %1586  ;;  %1382 = vmatpush3.msra.mxu0 %v1583_v2  ;;  %1453 = vmatpush3.msra.mxu1 %v1583_v2  ;;  %1612 = vtanh.f32 %v557_v13 }
 0x178   : > { %805 = vxpose.xlu0.b32.cont [9/16] %v1579_v61, 128  ;;  %1383 = vmatprep.subr.mxu0 %v1587_v6  ;;  %v1589_v12 = vpop.eup %1588  ;;  %1614 = vtanh.f32 %v707_v17 }
 0x179   : > { %1438 = vmatprep.subr.mxu1 %v1587_v6  ;;  %1384 = vmatpush3.msra.mxu0 %v1587_v6  ;;  %v1591_v16 = vpop.eup %1590  ;;  %1616 = vtanh.f32 %v702_v15 }
 0x17a   : > { %1454 = vmatpush3.msra.mxu1 %v1587_v6  ;;  %1385 = vmatprep.subr.mxu0 %v1585_v4  ;;  %v1593_v18 = vpop.eup %1592  ;;  %1618 = vtanh.f32 %v562_v21 }
 0x17b   : > { %1439 = vmatprep.subr.mxu1 %v1585_v4  ;;  %1386 = vmatpush3.msra.mxu0 %v1585_v4  ;;  %v1595_v20 = vpop.eup %1594  ;;  %1620 = vtanh.f32 %v697_v19 }
 0x17c   : > { %806 = vxpose.xlu0.b32.cont [10/16] %v1581_v63, 128  ;;  %1455 = vmatpush3.msra.mxu1 %v1585_v4  ;;  %v1597_v22 = vpop.eup %1596  ;;  %1622 = vtanh.f32 %v692_v11 }
 0x17d   : > { %1387 = vmatprep.subr.mxu0 %v1589_v12  ;;  %1440 = vmatprep.subr.mxu1 %v1589_v12  ;;  %v1599_v23 = vpop.eup %1598  ;;  %1624 = vtanh.f32 %v687_v14 }
 0x17e   : > { %1388 = vmatpush3.msra.mxu0 %v1589_v12  ;;  %1456 = vmatpush3.msra.mxu1 %v1589_v12  ;;  %v1601_v1 = vpop.eup %1600 }
 0x17f   : > { %1389 = vmatprep.subr.mxu0 %v1593_v18  ;;  %1441 = vmatprep.subr.mxu1 %v1593_v18  ;;  %v1603_v24 = vpop.eup %1602 }
 0x180   : > { %807 = vxpose.xlu0.b32.cont [11/16] %v1591_v16, 128  ;;  %1390 = vmatpush3.msra.mxu0 %v1593_v18  ;;  %v1605_v25 = vpop.eup %1604 }
 0x181   : > { %1457 = vmatpush3.msra.mxu1 %v1593_v18  ;;  %1391 = vmatprep.subr.mxu0 %v1595_v20  ;;  %v1607_v7 = vpop.eup %1606 }
 0x182   : > { %1442 = vmatprep.subr.mxu1 %v1595_v20  ;;  %1392 = vmatpush3.msra.mxu0 %v1595_v20  ;;  %v1609_v26 = vpop.eup %1608 }
 0x183   : > { %1458 = vmatpush3.msra.mxu1 %v1595_v20  ;;  %1393 = vmatprep.subr.mxu0 %v1599_v23  ;;  %v1611_v10 = vpop.eup %1610 }
 0x184   : > { %808 = vxpose.xlu0.b32.cont [12/16] %v1597_v22, 128  ;;  %1443 = vmatprep.subr.mxu1 %v1599_v23  ;;  %v1613_v27 = vpop.eup %1612 }
 0x185   : > { %1394 = vmatpush3.msra.mxu0 %v1599_v23  ;;  %1459 = vmatpush3.msra.mxu1 %v1599_v23  ;;  %v1615_v28 = vpop.eup %1614 }
 0x186   : > { %1395 = vmatprep.subr.mxu0 %v1603_v24  ;;  %1444 = vmatprep.subr.mxu1 %v1603_v24  ;;  %v1617_v29 = vpop.eup %1616 }
 0x187   : > { %1396 = vmatpush3.msra.mxu0 %v1603_v24  ;;  %1460 = vmatpush3.msra.mxu1 %v1603_v24  ;;  %v1619_v30 = vpop.eup %1618 }
 0x188   : > { %809 = vxpose.xlu0.b32.cont [13/16] %v1601_v1, 128  ;;  %1397 = vmatprep.subr.mxu0 %v1605_v25  ;;  %v1621_v31 = vpop.eup %1620 }
 0x189   : > { %1445 = vmatprep.subr.mxu1 %v1605_v25  ;;  %1398 = vmatpush3.msra.mxu0 %v1605_v25  ;;  %v1623_v32 = vpop.eup %1622 }
 0x18a   : > { %1461 = vmatpush3.msra.mxu1 %v1605_v25  ;;  %1399 = vmatprep.subr.mxu0 %v1607_v7  ;;  %v1625_v33 = vpop.eup %1624 }
 0x18b   : > { %1446 = vmatprep.subr.mxu1 %v1607_v7  ;;  %1400 = vmatpush3.msra.mxu0 %v1607_v7 }
 0x18c   : > { %810 = vxpose.xlu0.b32.cont [14/16] %v1609_v26, 128  ;;  %1462 = vmatpush3.msra.mxu1 %v1607_v7 }
 0x18d   : > { %1401 = vmatprep.subr.mxu0 %v1611_v10  ;;  %1447 = vmatprep.subr.mxu1 %v1611_v10 }
 0x18e   : > { %1402 = vmatpush3.msra.mxu0 %v1611_v10  ;;  %1463 = vmatpush3.msra.mxu1 %v1611_v10 }
 0x18f   : > { %1403 = vmatprep.subr.mxu0 %v1615_v28  ;;  %1448 = vmatprep.subr.mxu1 %v1615_v28 }
 0x190   : > { %811 = vxpose.xlu0.b32.cont [15/16] %v1613_v27, 128  ;;  %1404 = vmatpush3.msra.mxu0 %v1615_v28 }
 0x191   : > { %1464 = vmatpush3.msra.mxu1 %v1615_v28  ;;  %1405 = vmatprep.subr.mxu0 %v1617_v29 }
 0x192   : > { %1449 = vmatprep.subr.mxu1 %v1617_v29  ;;  %1406 = vmatpush3.msra.mxu0 %v1617_v29 }
 0x193   : > { %1465 = vmatpush3.msra.mxu1 %v1617_v29  ;;  %1407 = vmatprep.subr.mxu0 %v1621_v31 }
 0x194   : > { %812 = vxpose.xlu0.b32.end [16/16] %v1619_v30, 128  ;;  %1450 = vmatprep.subr.mxu1 %v1621_v31 }
 0x195   : > { %1408 = vmatpush3.msra.mxu0 %v1621_v31  ;;  %1466 = vmatpush3.msra.mxu1 %v1621_v31 }
 0x196   : > { %1409 = vmatprep.subr.mxu0 %v1623_v32  ;;  %1451 = vmatprep.subr.mxu1 %v1623_v32 }
 0x197   : > { %1410 = vmatpush3.msra.mxu0 %v1623_v32  ;;  %1467 = vmatpush3.msra.mxu1 %v1623_v32 }
 0x198   : > { %1411 = vmatprep.subr.mxu0 %v1625_v33  ;;  %1452 = vmatprep.subr.mxu1 %v1625_v33 }
 0x199   : > { %1412 = vmatpush3.msra.mxu0 %v1625_v33  ;;  %1468 = vmatpush3.msra.mxu1 %v1625_v33 }
 0x1d4   : > { %v813_v34 = vpop.trf.xlu0 }
 0x1d5   : > { %1413 = vmatprep.mubr.f32.mxu0 %v813_v34 }
 0x1d8   : > { %v814_v35 = vpop.trf.xlu0 }
 0x1d9   : > { %1414 = vmatmul.mubr.f32.vlgmr.msra.gmra.mxu0 %v814_v35 }
 0x1dc   : > { %v815_v36 = vpop.trf.xlu0 }
 0x1dd   : > { %1416 = vmatprep.mubr.f32.mxu0 %v815_v36 }
 0x1e0   : > { %v816_v37 = vpop.trf.xlu0 }
 0x1e1   : > { %1417 = vmatmul.mubr.f32.gmra.mxu0 %v816_v37 }
 0x1e4   : > { %v817_v38 = vpop.trf.xlu0 }
 0x1e5   : > { %1419 = vmatprep.mubr.f32.mxu0 %v817_v38 }
 0x1e8   : > { %v818_v39 = vpop.trf.xlu0 }
 0x1e9   : > { %1420 = vmatmul.mubr.f32.gmra.mxu0 %v818_v39 }
 0x1ec   : > { %v819_v40 = vpop.trf.xlu0 }
 0x1ed   : > { %1422 = vmatprep.mubr.f32.mxu0 %v819_v40 }
 0x1f0   : > { %v820_v41 = vpop.trf.xlu0 }
 0x1f1   : > { %1423 = vmatmul.mubr.f32.gmra.mxu0 %v820_v41 }
 0x1f4   : > { %v821_v42 = vpop.trf.xlu0 }
 0x1f5   : > { %1425 = vmatprep.mubr.f32.mxu1 %v821_v42 }
 0x1f8   : > { %v822_v43 = vpop.trf.xlu0 }
 0x1f9   : > { %1426 = vmatmul.mubr.f32.vlgmr.msra.gmra.mxu1 %v822_v43 }
 0x1fc   : > { %v823_v44 = vpop.trf.xlu0 }
 0x1fd   : > { %1428 = vmatprep.mubr.f32.mxu1 %v823_v44 }
 0x200   : > { %v824_v45 = vpop.trf.xlu0 }
 0x201   : > { %1429 = vmatmul.mubr.f32.gmra.mxu1 %v824_v45 }
 0x204   : > { %v825_v46 = vpop.trf.xlu0 }
 0x205   : > { %1431 = vmatprep.mubr.f32.mxu1 %v825_v46 }
 0x208   : > { %v826_v47 = vpop.trf.xlu0 }
 0x209   : > { %1432 = vmatmul.mubr.f32.gmra.mxu1 %v826_v47 }
 0x20c   : > { %v827_v48 = vpop.trf.xlu0 }
 0x20d   : > { %1434 = vmatprep.mubr.f32.mxu1 %v827_v48 }
 0x210   : > { %v828_v49 = vpop.trf.xlu0 }
 0x211   : > { %1435 = vmatmul.mubr.f32.gmra.mxu1 %v828_v49 }
 0x299   : > { %v1415_v50 = vpop.f32.mrf.mxu0 }
 0x29a   : > { %991 = vst [vmem:[%s2149_s2 + $0x8] sm:$0xff] %v1415_v50 }
 0x29b   : > { %v895_v51 = vpop.f32.mrf.mxu0 }
 0x29c   : > { %990 = vst [vmem:[%s2149_s2] sm:$0xff] %v895_v51 }
 0x2a1   : > { %v1418_v52 = vpop.f32.mrf.mxu0 }
 0x2a2   : > { %993 = vst [vmem:[%s2149_s2 + $0x18] sm:$0xff] %v1418_v52 }
 0x2a3   : > { %v905_v53 = vpop.f32.mrf.mxu0 }
 0x2a4   : > { %992 = vst [vmem:[%s2149_s2 + $0x10] sm:$0xff] %v905_v53 }
 0x2a9   : > { %v1421_v54 = vpop.f32.mrf.mxu0 }
 0x2aa   : > { %995 = vst [vmem:[%s2149_s2 + $0x28] sm:$0xff] %v1421_v54 }
 0x2ab   : > { %v915_v55 = vpop.f32.mrf.mxu0 }
 0x2ac   : > { %994 = vst [vmem:[%s2149_s2 + $0x20] sm:$0xff] %v915_v55 }
 0x2b1   : > { %v1424_v56 = vpop.f32.mrf.mxu0 }
 0x2b2   : > { %997 = vst [vmem:[%s2149_s2 + $0x38] sm:$0xff] %v1424_v56 }
 0x2b3   : > { %v925_v57 = vpop.f32.mrf.mxu0 }
 0x2b4   : > { %996 = vst [vmem:[%s2149_s2 + $0x30] sm:$0xff] %v925_v57 }
 0x2b9   : > { %v1427_v58 = vpop.f32.mrf.mxu1 }
 0x2ba   : > { %999 = vst [vmem:[%s2149_s2 + $0x48] sm:$0xff] %v1427_v58 }
 0x2bb   : > { %v935_v59 = vpop.f32.mrf.mxu1 }
 0x2bc   : > { %998 = vst [vmem:[%s2149_s2 + $0x40] sm:$0xff] %v935_v59 }
 0x2c1   : > { %v1430_v60 = vpop.f32.mrf.mxu1 }
 0x2c2   : > { %1001 = vst [vmem:[%s2149_s2 + $0x58] sm:$0xff] %v1430_v60 }
 0x2c3   : > { %v945_v61 = vpop.f32.mrf.mxu1 }
 0x2c4   : > { %1000 = vst [vmem:[%s2149_s2 + $0x50] sm:$0xff] %v945_v61 }
 0x2c9   : > { %v1433_v62 = vpop.f32.mrf.mxu1 }
 0x2ca   : > { %1003 = vst [vmem:[%s2149_s2 + $0x68] sm:$0xff] %v1433_v62 }
 0x2cb   : > { %v955_v63 = vpop.f32.mrf.mxu1 }
 0x2cc   : > { %1002 = vst [vmem:[%s2149_s2 + $0x60] sm:$0xff] %v955_v63 }
 0x2d1   : > { %v1436_v0 = vpop.f32.mrf.mxu1 }
 0x2d2   : > { %1005 = vst [vmem:[%s2149_s2 + $0x78] sm:$0xff] %v1436_v0 }
 0x2d3   : > { %v965_v2 = vpop.f32.mrf.mxu1 }
 0x2d4   : > { %1004 = vst [vmem:[%s2149_s2 + $0x70] sm:$0xff] %v965_v2 }
 0x2d5   : > { %1747 = shalt.err (!%p1744_p12)
}
 0x2d6   : > { %s1748_s12 = scalar_lea.hbm %s2170_s0, 2048  ;;  %s1752_s15 = scalar_lea.hbm %s2228_s6, 4096 }
 0x2d7   : > { %p1749_p13 = scmp.ne.s32.totalorder %s2170_s0, %s1748_s12  ;;  %p1753_p10 = scmp.lt.s32.totalorder %s2170_s0, %s2228_s6 }
 0x2d8   : > { %p1754_p7 = scmp.lt.s32.totalorder %s1752_s15, %s1748_s12 }
 0x2d9   : > { %p1750_p0 = pnand %p1749_p13, %p1969_p3 }
 0x2da   : > { %p1755_p1 = por %p1754_p7, %p1753_p10 }
 0x2db   : > { %p1751_p5 = pneg %p1750_p0 }
 0x2dd   : > { %p1756_p4 = pnand %p1755_p1, %p1751_p5 }
 0x2df   : > { %1759 = shalt.err (!%p1756_p4)
}
 0x2e0   : > { %s1835_s19 = smov 128   ;;  %s1836_s8 = smov 8  }
 0x2e1   : > { %1481 = dma.vmem_to_hbm [thread:$0]  (%p1969_p3), %s2172_s13, 2048, %s2170_s0, %s1007_s17, %s1835_s19, %s1835_s19, %s1836_s8  }
 0x2e2 PF: > { %s1035_s2 = sand.u32 1, %s1806_s21   ;;  %p2251_p8 = scmp.ge.s32.totalorder %s1826_s26, 2 }
 0x2e3   : > { %s1036_s11 = scalar_lea.sflag [#allocation4], %s1035_s2 }
 0x2e4   : > { %p1498_p2 = pnand %p2251_p8, %p1917_p6 }
 0x2e6   : > { %p1499_p11 = pneg %p1498_p2 }
 0x2e8   : > { %1801 = dma.done.wait (%p1499_p11), %s1036_s11, 2048  }
 0x2e9   : > { %1803 = vsyncadd (%p1499_p11), %s1036_s11, 4294965248  ;;  %s26_s26 = sadd.s32 1, %s1826_s26   ;;  %s2252_s9 = sld [smem:[#allocation16_spill]] }
 0x2ea   : > { %p23_p9 = scmp.ge.s32.totalorder %s26_s26, 4   ;;  %s2253_s21 = smov %s1810_s22 }
 0x2eb   : > { %s2254_s22 = smov %s1814_s23  ;;  %s2255_s23 = smov %s1980_s16 }
 0x2ec   : > { %s2256_s24 = smov %s1822_s25  ;;  %25 = sbr.rel (!%p23_p9) target bundleno = 14 (0xe), region = 114 }
 0x2ef   : > { %s2257_s25 = smov %s2252_s9 }
 0x2f1   :  { %1041 = vsyncpa [#allocation3], 1 }
 0x2f2   :  { %1043 = vsyncpa [#allocation3 + $0x1], 1 }
 0x2f3   :  { %1044 = vsyncpa [#allocation6], 1 }
 0x2f4   :  { %1046 = vsyncpa [#allocation6 + $0x1], 1 }
 0x2f5   :  { %1047 = vsyncpa [#allocation9], 1 }
 0x2f6   :  { %1048 = vsyncpa [#allocation4], 1 }
 0x2f7   :  { %1050 = vsyncpa [#allocation4 + $0x1], 1 }

</bundles_post_ra>
